<compile_context>
chip_gen: v7x
topology: tpu7x:2x2x1
jax: 0.10.0
libtpu: 0.0.40
codegen_flags: <defaults>
</compile_context>

<pallas_src>
import jax
import jax.numpy as jnp
from jax.experimental import pallas as pl
from jax.experimental.pallas import tpu as pltpu


def _softplus(y):
    # Numerically stable softplus: log(1+exp(y)) = max(y, 0) + log1p(exp(-|y|))
    return jnp.maximum(y, 0.0) + jnp.log1p(jnp.exp(-jnp.abs(y)))


def _seed_bin_tile_kernel(x_ref, w1_ref, b1_ref, w2_ref, b2_ref, o_ref):
    # x_ref : (C, tp)         w1_ref: (mlp_dim, C)       b1_ref: (mlp_dim, 1)
    # o_ref : (n_bins, tp)    w2_ref: (n_bins, mlp_dim)  b2_ref: (n_bins, 1)
    # TODO(synk): for deployments where C stays tiny (<32), a VPU row-broadcast
    # sum could replace the padded-contraction MXU pass; irrelevant while the
    # kernel is HBM-bound (MXU work is hidden under the DMA).
    h = jnp.dot(w1_ref[...], x_ref[...], preferred_element_type=jnp.float32)
    h = jnp.maximum(h + b1_ref[...], 0.0)                       # ReLU
    y = jnp.dot(w2_ref[...], h, preferred_element_type=jnp.float32) + b2_ref[...]
    o_ref[...] = _softplus(y).astype(o_ref.dtype)


def _seed_bin_whole_kernel(x_ref, w1_ref, b1_ref, w2_ref, b2_ref, o_ref):
    # Whole problem VMEM-resident (tiny inputs): no grid, no pipeline overhead.
    # x_ref: (N, C, P), o_ref: (N, n_bins, P); N is small -> static unroll.
    for i in range(x_ref.shape[0]):
        h = jnp.dot(w1_ref[...], x_ref[i], preferred_element_type=jnp.float32)
        h = jnp.maximum(h + b1_ref[...], 0.0)
        y = jnp.dot(w2_ref[...], h, preferred_element_type=jnp.float32) + b2_ref[...]
        o_ref[i] = _softplus(y).astype(o_ref.dtype)


def _vmem_budget_bytes():
    """Generation-aware scoped-VMEM budget (~3/4 of physical VMEM).

    v5e/v6e (128 MiB) -> ~96 MiB, v7x (64 MiB) -> ~48 MiB.  Falls back to the
    smallest (v7x-safe) budget if the hardware query is unavailable.
    """
    try:
        cap = int(pltpu.get_tpu_info().vmem_capacity_bytes)
    except Exception:
        cap = 64 << 20
    return (cap * 3) // 4


def _forward_tiled(x, w1t, b1_2d, w2t, b2_2d, out_dtype, tp):
    N, C, P = x.shape
    mlp_dim = w1t.shape[0]
    n_bins = w2t.shape[0]
    out_isz = jnp.dtype(out_dtype).itemsize

    budget = _vmem_budget_bytes()
    # Per-pixel VMEM: double-buffered x & out tiles plus f32 intermediates
    # (h, relu'd h, softplus temporaries), with the params counted separately.
    per_pixel = 4 * (2 * C + 2 * mlp_dim + 3 * n_bins) + out_isz * 2 * n_bins
    param_bytes = 2 * 4 * (mlp_dim * C + n_bins * mlp_dim + mlp_dim + n_bins)

    if tp is None:
        # Largest lane-dense pixel tile that fits the budget (tp and the VMEM
        # limit are derived jointly, as one unit).
        avail = budget - param_bytes - (2 << 20)
        tp = max(128, (avail // per_pixel) // 128 * 128)
        tp = min(tp, 16384)          # keep per-step DMA latency bounded
    else:
        tp = max(128, (int(tp) // 128) * 128)
    tp = min(tp, pl.cdiv(P, 128) * 128)

    grid = (N, pl.cdiv(P, tp))       # ragged last pixel block is clipped
    est = per_pixel * tp + param_bytes + (4 << 20)
    vmem_limit = int(min(budget, max(est, 32 << 20)))

    return pl.pallas_call(
        _seed_bin_tile_kernel,
        out_shape=jax.ShapeDtypeStruct((N, n_bins, P), out_dtype),
        grid_spec=pltpu.PrefetchScalarGridSpec(
            num_scalar_prefetch=0,
            grid=grid,
            in_specs=[
                pl.BlockSpec((pl.Squeezed(), C, tp), lambda n, p: (n, 0, p)),
                pl.BlockSpec((mlp_dim, C), lambda n, p: (0, 0)),        # resident
                pl.BlockSpec((mlp_dim, 1), lambda n, p: (0, 0)),        # resident
                pl.BlockSpec((n_bins, mlp_dim), lambda n, p: (0, 0)),   # resident
                pl.BlockSpec((n_bins, 1), lambda n, p: (0, 0)),         # resident
            ],
            out_specs=pl.BlockSpec((pl.Squeezed(), n_bins, tp),
                                   lambda n, p: (n, 0, p)),
        ),
        compiler_params=pltpu.CompilerParams(
            dimension_semantics=("parallel", "parallel"),
            vmem_limit_bytes=vmem_limit,
        ),
    )(x, w1t, b1_2d, w2t, b2_2d)


def _forward_whole(x, w1t, b1_2d, w2t, b2_2d, out_dtype):
    N, C, P = x.shape
    n_bins = w2t.shape[0]
    # No grid: whole problem lands in VMEM as one block; zero per-step overhead.
    return pl.pallas_call(
        _seed_bin_whole_kernel,
        out_shape=jax.ShapeDtypeStruct((N, n_bins, P), out_dtype),
    )(x, w1t, b1_2d, w2t, b2_2d)


def seed_bin_regressor_unnormed(x_nchw, w1t, b1, w2t, b2, *,
                                out_dtype=jnp.float32, tp=None,
                                single_block=None):
    """Forward pass; returns (B_centers, B_centers) like the PyTorch module.

    Args:
      x_nchw: (N, C, H, W) float32 input.
      w1t: (mlp_dim, C)       == conv1.weight[:, :, 0, 0]
      b1:  (mlp_dim,)         == conv1.bias
      w2t: (n_bins, mlp_dim)  == conv2.weight[:, :, 0, 0]
      b2:  (n_bins,)          == conv2.bias
      out_dtype: output dtype.  jnp.bfloat16 halves the dominant store traffic
        on this mem-bound kernel (accumulation stays f32); default f32 matches
        PyTorch exactly.
      tp: optional pixel-tile override (rounded to a multiple of 128);
        None -> derived from the generation-aware VMEM budget.
      single_block: force (True) / forbid (False) the no-grid tiny-problem
        path; None -> auto (whole problem must fit a few MiB of VMEM).
    """
    N, C, H, W = x_nchw.shape
    mlp_dim = w1t.shape[0]
    n_bins = w2t.shape[0]
    P = H * W

    # Pixels on lanes: (N, C, H, W) -> (N, C, P) is a free, layout-compatible
    # reshape; (N, n_bins, P) -> (N, n_bins, H, W) on the way out is equally free.
    x = x_nchw.reshape(N, C, P)
    b1_2d = b1.reshape(mlp_dim, 1)
    b2_2d = b2.reshape(n_bins, 1)

    if single_block is None:
        p_pad = pl.cdiv(P, 128) * 128
        whole_bytes = (4 * (N * C * p_pad + 2 * mlp_dim * p_pad + 3 * n_bins * p_pad)
                       + jnp.dtype(out_dtype).itemsize * N * n_bins * p_pad
                       + 2 * 4 * (mlp_dim * C + n_bins * mlp_dim))
        single_block = (N <= 8) and (whole_bytes <= (8 << 20))

    if single_block:
        out = _forward_whole(x, w1t, b1_2d, w2t, b2_2d, out_dtype)
    else:
        out = _forward_tiled(x, w1t, b1_2d, w2t, b2_2d, out_dtype, tp)

    b_centers = out.reshape(N, n_bins, H, W)
    return b_centers, b_centers


def _reference(x, w1t, b1, w2t, b2):
    n, c, h, w = x.shape
    xf = x.reshape(n, c, h * w)
    hid = jnp.maximum(jnp.einsum("oc,ncp->nop", w1t, xf) + b1[None, :, None], 0.0)
    y = jax.nn.softplus(jnp.einsum("om,nmp->nop", w2t, hid) + b2[None, :, None])
    return y.reshape(n, w2t.shape[0], h, w)


if __name__ == "__main__":
    # Small shapes consistent with the module's forward.
    N, C, H, W = 2, 4, 16, 16
    mlp_dim, n_bins = 32, 16

    key = jax.random.PRNGKey(0)
    k_x, k_w1, k_b1, k_w2, k_b2, k_x2 = jax.random.split(key, 6)

    x = jax.random.normal(k_x, (N, C, H, W), dtype=jnp.float32)
    # Conv2d(C, mlp_dim, 1).weight[:, :, 0, 0] has shape (mlp_dim, C), etc.
    w1t = jax.random.normal(k_w1, (mlp_dim, C), dtype=jnp.float32) * 0.1
    b1 = jax.random.normal(k_b1, (mlp_dim,), dtype=jnp.float32) * 0.1
    w2t = jax.random.normal(k_w2, (n_bins, mlp_dim), dtype=jnp.float32) * 0.1
    b2 = jax.random.normal(k_b2, (n_bins,), dtype=jnp.float32) * 0.1

    # 1) Tiny-problem path (no grid, whole problem in VMEM), exact f32.
    bc, bc_unnorm = seed_bin_regressor_unnormed(x, w1t, b1, w2t, b2)
    jax.block_until_ready((bc, bc_unnorm))
    ref = _reference(x, w1t, b1, w2t, b2)
    assert bc.shape == (N, n_bins, H, W)
    assert jnp.allclose(bc, ref, atol=1e-5, rtol=1e-5)
    assert jnp.allclose(bc, bc_unnorm)

    # 2) Tiled/grid path (forced), including a ragged pixel block (P=480) and
    #    multiple pixel tiles per batch element.
    H2, W2 = 24, 20
    x2 = jax.random.normal(k_x2, (N, C, H2, W2), dtype=jnp.float32)
    bc2, _ = seed_bin_regressor_unnormed(x2, w1t, b1, w2t, b2,
                                         tp=128, single_block=False)
    jax.block_until_ready(bc2)
    ref2 = _reference(x2, w1t, b1, w2t, b2)
    assert bc2.shape == (N, n_bins, H2, W2)
    assert jnp.allclose(bc2, ref2, atol=1e-5, rtol=1e-5)

    # 3) bf16-output path (halves store traffic; f32 accumulation in-kernel).
    bc3, _ = seed_bin_regressor_unnormed(x, w1t, b1, w2t, b2,
                                         out_dtype=jnp.bfloat16)
    jax.block_until_ready(bc3)
    assert bc3.dtype == jnp.bfloat16
    assert jnp.allclose(bc3.astype(jnp.float32), ref, atol=2e-2, rtol=2e-2)

    print("KERNEL_OK")
</pallas_src>

<mosaic_0001>
module attributes {stable_mosaic.version = 11 : i64} {
  func.func @_seed_bin_whole_kernel(%arg0: memref<2x4x256xf32, #tpu.memory_space<vmem>>, %arg1: memref<32x4xf32, #tpu.memory_space<vmem>>, %arg2: memref<32x1xf32, #tpu.memory_space<vmem>>, %arg3: memref<16x32xf32, #tpu.memory_space<vmem>>, %arg4: memref<16x1xf32, #tpu.memory_space<vmem>>, %arg5: memref<2x16x256xf32, #tpu.memory_space<vmem>>) attributes {dimension_semantics = [], scalar_prefetch = 0 : i64, scratch_operands = 0 : i64, tpu.core_type = #tpu.core_type<tc>} {
    %c0 = arith.constant 0 : index
    %c0_0 = arith.constant 0 : index
    %0 = vector.load %arg1[%c0, %c0_0] : memref<32x4xf32, #tpu.memory_space<vmem>>, vector<32x4xf32>
    %c0_1 = arith.constant 0 : index
    %c0_2 = arith.constant 0 : index
    %c0_3 = arith.constant 0 : index
    %1 = vector.load %arg0[%c0_1, %c0_2, %c0_3] : memref<2x4x256xf32, #tpu.memory_space<vmem>>, vector<1x4x256xf32>
    %2 = vector.shape_cast %1 : vector<1x4x256xf32> to vector<4x256xf32>
    %cst = arith.constant dense<0.000000e+00> : vector<32x256xf32>
    %3 = tpu.matmul %0, %2, %cst {dimension_numbers = #tpu.dot_dimension_numbers<[1], [0], [0], [1], [0, 0, 1, 1], [], []>} : vector<32x4xf32>, vector<4x256xf32>, vector<32x256xf32> -> vector<32x256xf32>
    %c0_4 = arith.constant 0 : index
    %c0_5 = arith.constant 0 : index
    %4 = vector.load %arg2[%c0_4, %c0_5] : memref<32x1xf32, #tpu.memory_space<vmem>>, vector<32x1xf32>
    %5 = vector.broadcast %4 : vector<32x1xf32> to vector<32x256xf32>
    %6 = arith.addf %3, %5 : vector<32x256xf32>
    %cst_6 = arith.constant 0.000000e+00 : f32
    %7 = vector.broadcast %cst_6 : f32 to vector<32x256xf32>
    %8 = arith.maximumf %6, %7 : vector<32x256xf32>
    %c0_7 = arith.constant 0 : index
    %c0_8 = arith.constant 0 : index
    %9 = vector.load %arg3[%c0_7, %c0_8] : memref<16x32xf32, #tpu.memory_space<vmem>>, vector<16x32xf32>
    %cst_9 = arith.constant dense<0.000000e+00> : vector<16x256xf32>
    %10 = tpu.matmul %9, %8, %cst_9 {dimension_numbers = #tpu.dot_dimension_numbers<[1], [0], [0], [1], [0, 0, 1, 1], [], []>} : vector<16x32xf32>, vector<32x256xf32>, vector<16x256xf32> -> vector<16x256xf32>
    %c0_10 = arith.constant 0 : index
    %c0_11 = arith.constant 0 : index
    %11 = vector.load %arg4[%c0_10, %c0_11] : memref<16x1xf32, #tpu.memory_space<vmem>>, vector<16x1xf32>
    %12 = vector.broadcast %11 : vector<16x1xf32> to vector<16x256xf32>
    %13 = arith.addf %10, %12 : vector<16x256xf32>
    %cst_12 = arith.constant 0.000000e+00 : f32
    %14 = vector.broadcast %cst_12 : f32 to vector<16x256xf32>
    %15 = arith.maximumf %13, %14 : vector<16x256xf32>
    %16 = math.absf %13 : vector<16x256xf32>
    %cst_13 = arith.constant 0.000000e+00 : f32
    %17 = vector.broadcast %cst_13 : f32 to vector<16x256xf32>
    %18 = arith.subf %17, %16 : vector<16x256xf32>
    %19 = math.exp %18 : vector<16x256xf32>
    %20 = math.log1p %19 : vector<16x256xf32>
    %21 = arith.addf %15, %20 : vector<16x256xf32>
    %c0_14 = arith.constant 0 : index
    %c0_15 = arith.constant 0 : index
    %c0_16 = arith.constant 0 : index
    %22 = vector.load %arg5[%c0_14, %c0_15, %c0_16] : memref<2x16x256xf32, #tpu.memory_space<vmem>>, vector<1x16x256xf32>
    %23 = vector.shape_cast %22 : vector<1x16x256xf32> to vector<16x256xf32>
    %24 = vector.shape_cast %21 : vector<16x256xf32> to vector<1x16x256xf32>
    tpu.vector_store %arg5[%c0_14, %c0_15, %c0_16], %24 {strides = array<i32>} : memref<2x16x256xf32, #tpu.memory_space<vmem>>, vector<1x16x256xf32>,
    %c0_17 = arith.constant 0 : index
    %c0_18 = arith.constant 0 : index
    %25 = vector.load %arg1[%c0_17, %c0_18] : memref<32x4xf32, #tpu.memory_space<vmem>>, vector<32x4xf32>
    %c1 = arith.constant 1 : index
    %c0_19 = arith.constant 0 : index
    %c0_20 = arith.constant 0 : index
    %26 = vector.load %arg0[%c1, %c0_19, %c0_20] : memref<2x4x256xf32, #tpu.memory_space<vmem>>, vector<1x4x256xf32>
    %27 = vector.shape_cast %26 : vector<1x4x256xf32> to vector<4x256xf32>
    %cst_21 = arith.constant dense<0.000000e+00> : vector<32x256xf32>
    %28 = tpu.matmul %25, %27, %cst_21 {dimension_numbers = #tpu.dot_dimension_numbers<[1], [0], [0], [1], [0, 0, 1, 1], [], []>} : vector<32x4xf32>, vector<4x256xf32>, vector<32x256xf32> -> vector<32x256xf32>
    %c0_22 = arith.constant 0 : index
    %c0_23 = arith.constant 0 : index
    %29 = vector.load %arg2[%c0_22, %c0_23] : memref<32x1xf32, #tpu.memory_space<vmem>>, vector<32x1xf32>
    %30 = vector.broadcast %29 : vector<32x1xf32> to vector<32x256xf32>
    %31 = arith.addf %28, %30 : vector<32x256xf32>
    %cst_24 = arith.constant 0.000000e+00 : f32
    %32 = vector.broadcast %cst_24 : f32 to vector<32x256xf32>
    %33 = arith.maximumf %31, %32 : vector<32x256xf32>
    %c0_25 = arith.constant 0 : index
    %c0_26 = arith.constant 0 : index
    %34 = vector.load %arg3[%c0_25, %c0_26] : memref<16x32xf32, #tpu.memory_space<vmem>>, vector<16x32xf32>
    %cst_27 = arith.constant dense<0.000000e+00> : vector<16x256xf32>
    %35 = tpu.matmul %34, %33, %cst_27 {dimension_numbers = #tpu.dot_dimension_numbers<[1], [0], [0], [1], [0, 0, 1, 1], [], []>} : vector<16x32xf32>, vector<32x256xf32>, vector<16x256xf32> -> vector<16x256xf32>
    %c0_28 = arith.constant 0 : index
    %c0_29 = arith.constant 0 : index
    %36 = vector.load %arg4[%c0_28, %c0_29] : memref<16x1xf32, #tpu.memory_space<vmem>>, vector<16x1xf32>
    %37 = vector.broadcast %36 : vector<16x1xf32> to vector<16x256xf32>
    %38 = arith.addf %35, %37 : vector<16x256xf32>
    %cst_30 = arith.constant 0.000000e+00 : f32
    %39 = vector.broadcast %cst_30 : f32 to vector<16x256xf32>
    %40 = arith.maximumf %38, %39 : vector<16x256xf32>
    %41 = math.absf %38 : vector<16x256xf32>
    %cst_31 = arith.constant 0.000000e+00 : f32
    %42 = vector.broadcast %cst_31 : f32 to vector<16x256xf32>
    %43 = arith.subf %42, %41 : vector<16x256xf32>
    %44 = math.exp %43 : vector<16x256xf32>
    %45 = math.log1p %44 : vector<16x256xf32>
    %46 = arith.addf %40, %45 : vector<16x256xf32>
    %c1_32 = arith.constant 1 : index
    %c0_33 = arith.constant 0 : index
    %c0_34 = arith.constant 0 : index
    %47 = vector.load %arg5[%c1_32, %c0_33, %c0_34] : memref<2x16x256xf32, #tpu.memory_space<vmem>>, vector<1x16x256xf32>
    %48 = vector.shape_cast %47 : vector<1x16x256xf32> to vector<16x256xf32>
    %49 = vector.shape_cast %46 : vector<16x256xf32> to vector<1x16x256xf32>
    tpu.vector_store %arg5[%c1_32, %c0_33, %c0_34], %49 {strides = array<i32>} : memref<2x16x256xf32, #tpu.memory_space<vmem>>, vector<1x16x256xf32>,
    return
  }
}

</mosaic_0001>

<bundles_post_ra>
// kernel: tpu_custom_call.1
= control target key start
LH: loop header
LB: loop body
LE: loop exit
PB: predicated region body
PF: predicated region fallthrough
CT: control target
= control target key end

     0   :  { %vm65_vm0 = vcmask 1043456   ;;  %v750_v2 = vmov 0.0   ;;  %vm52_vm1 = vcmask 31744   ;;  %v751_v5 = vmov 0   ;;  %s915_s0 = inlined_call_operand.vmem [shape: f32[2,4,256], index: 0, kind: input, shape index: {}]   ;;  %s916_s1 = inlined_call_operand.vmem [shape: f32[32,4], index: 1, kind: input, shape index: {}]   ;;  %s917_s2 = inlined_call_operand.vmem [shape: f32[32,1], index: 2, kind: input, shape index: {}]   ;;  %s918_s3 = inlined_call_operand.vmem [shape: f32[16,32], index: 3, kind: input, shape index: {}]   ;;  %s919_s4 = inlined_call_operand.vmem [shape: f32[16,1], index: 4, kind: input, shape index: {}]   ;;  %s920_s5 = inlined_call_operand.hbm [shape: f32[2,16,256], index: 5, kind: output, shape index: {}]  }
   0x1   :  { %v25_v0 = vld [vmem:[%s915_s0] sm:$0xff]  ;;  %134 = vmatprep.mubr.f32.mxu0 %v750_v2  ;;  %252 = vmatprep.mubr.f32.mxu1 %v750_v2  ;;  %v28_v6 = vld [vmem:[%s917_s2 + $0x10] sm:$0xff] }
   0x2   :  { %v51_v1 = vcombine.high %v25_v0, %v25_v0  ;;  %v26_v3 = vld [vmem:[%s917_s2] sm:$0xff]  ;;  %690 = vset.pattern.permute.xlu0 %v751_v5  ;;  %691 = vset.pattern.permute.xlu1 %v751_v5 }
   0x3   :  { %v796_v4 = vld [vmem:[%s916_s1] sm:$0xff]  ;;  %32 = vperm.xlu0 %690, %v26_v3  }
   0x4   :  { %652 = vmatprep.subr.msk.mxu0 %vm65_vm0, %v51_v1 }
   0x5   :  { %10 = vsyncpa [#allocation3], 0  ;;  %653 = vmatpush1.msk.msra.mxu0 %vm65_vm0, %v25_v0  ;;  %42 = vperm.xlu1 %691, %v28_v6   ;;  %v27_v7 = vld [vmem:[%s917_s2 + $0x8] sm:$0xff]  ;;  %v29_v8 = vld [vmem:[%s917_s2 + $0x18] sm:$0xff]  ;;  %vm181_vm2 = vcmask 261120  }
   0x6   :  { %654 = vmatmul.mubr.msk.f32.vlgmr.msra.gmra.mrb[0].mxu0 %vm52_vm1, %v796_v4  ;;  %v815_v9 = vld [vmem:[%s916_s1 + $0x8] sm:$0xff]  ;;  %v823_v10 = vld [vmem:[%s916_s1 + $0x10] sm:$0xff]  ;;  %v831_v11 = vld [vmem:[%s916_s1 + $0x18] sm:$0xff] }
   0x7   :  { %140 = vmatprep.mubr.f32.mxu0 %v750_v2  ;;  %37 = vperm.xlu0 %690, %v27_v7   ;;  %v169_v12 = vld [vmem:[%s919_s4] sm:$0xff]  ;;  %v170_v13 = vld [vmem:[%s919_s4 + $0x8] sm:$0xff] }
   0x8   :  { %v660_v42 = vld [vmem:[%s915_s0 + $0x8] sm:$0xff]  ;;  %v848_v48 = vld [vmem:[%s918_s3] sm:$0xff] }
   0x9   :  { %47 = vperm.xlu1 %691, %v29_v8   ;;  %v360_v47 = vcombine.high %v660_v42, %v660_v42  ;;  %v857_v49 = vld [vmem:[%s918_s3 + $0x8] sm:$0xff]  ;;  %s752_s3 = smov [#allocation2]  }
   0xa   :  { %655 = vmatmul.mubr.msk.f32.gmra.mrb[2].mxu0 %vm52_vm1, %v815_v9  ;;  %s641_s17 = sshll.u32 %s752_s3, 4  ;;  %s642_s17 = int_to_ptr.vmem [resolvable:$true] %s641_s17 }
   0xb   :  { %146 = vmatprep.mubr.f32.mxu0 %v750_v2  ;;  %341 = vperm.xlu0 %690, %v26_v3   ;;  %s726_s18 = scalar_lea.vmem %s642_s17, 1024  ;;  %p731_p1 = scmp.lt.s32.totalorder %s642_s17, %s642_s17 }
   0xc   :  { %p727_p0 = scmp.ne.s32.totalorder %s642_s17, %s726_s18  ;;  %p732_p2 = scmp.lt.s32.totalorder %s726_s18, %s726_s18 }
   0xd   :  { %346 = vperm.xlu1 %691, %v27_v7  }
   0xe   :  { %656 = vmatmul.mubr.msk.f32.gmra.mrb[4].mxu0 %vm52_vm1, %v823_v10  ;;  %p733_p3 = por %p732_p2, %p731_p1 }
   0xf   :  { %152 = vmatprep.mubr.f32.mxu0 %v750_v2  ;;  %351 = vperm.xlu0 %690, %v28_v6  }
  0x10   :  { %p734_p4 = pnand %p733_p3, %p727_p0 }
  0x11   :  { %356 = vperm.xlu1 %691, %v29_v8  }
  0x12   :  { %657 = vmatmul.mubr.msk.f32.gmra.mrb[6].mxu0 %vm52_vm1, %v831_v11 }
  0x13   :  { %558 = vmatprep.mubr.f32.mxu0 %v750_v2  ;;  %173 = vperm.xlu0 %690, %v169_v12  }
  0x15   :  { %178 = vperm.xlu1 %691, %v170_v13  }
  0x17   :  { %480 = vperm.xlu0 %690, %v169_v12  }
  0x19   :  { %485 = vperm.xlu1 %691, %v170_v13  }
  0x82   :  { %v33_v14 = vpop.permute.xlu0 %32 }
  0x84   :  { %v43_v23 = vpop.permute.xlu1 %42 }
  0x86   :  { %v38_v18 = vpop.permute.xlu0 %37 }
  0x88   :  { %v48_v34 = vpop.permute.xlu1 %47 }
  0x8a   :  { %v342_v50 = vpop.permute.xlu0 %341 }
  0x8c   :  { %v347_v51 = vpop.permute.xlu1 %346 }
  0x8e   :  { %v352_v52 = vpop.permute.xlu0 %351 }
  0x90   :  { %v357_v53 = vpop.permute.xlu1 %356 }
  0x92   :  { %v174_v54 = vpop.permute.xlu0 %173 }
  0x94   :  { %v179_v60 = vpop.permute.xlu1 %178 }
  0xd9   :  { %v136_v15 = vpop.f32.mrb[0].mxu0 }
  0xda   :  { %v138_v16 = vpop.f32.mrb[1].mxu0  ;;  %v137_v17 = vadd.f32 %v136_v15, %v33_v14 }
  0xdb   :  { %v139_v19 = vadd.f32 %v138_v16, %v33_v14 }
  0xdc   :  { %v159_v25 = vmax.f32 %v137_v17, 0.0 }
  0xdd   :  { %v142_v20 = vpop.f32.mrb[2].mxu0  ;;  %v160_v27 = vmax.f32 %v139_v19, 0.0 }
  0xde   :  { %v143_v21 = vadd.f32 %v142_v20, %v38_v18  ;;  %v144_v22 = vpop.f32.mrb[3].mxu0 }
  0xdf   :  { %v145_v24 = vadd.f32 %v144_v22, %v38_v18 }
  0xe0   :  { %v161_v26 = vmax.f32 %v143_v21, 0.0 }
  0xe1   :  { %v162_v28 = vmax.f32 %v145_v24, 0.0  ;;  %v148_v29 = vpop.f32.mrb[4].mxu0 }
  0xe2   :  { %v150_v30 = vpop.f32.mrb[5].mxu0  ;;  %v671_v31 = vpack.c.bf16 %v161_v26, %v159_v25  ;;  %v149_v33 = vadd.f32 %v148_v29, %v43_v23 }
  0xe3   :  { %v669_v32 = vpack.c.bf16 %v162_v28, %v160_v27  ;;  %v151_v35 = vadd.f32 %v150_v30, %v43_v23 }
  0xe4   :  { %v163_v40 = vmax.f32 %v149_v33, 0.0 }
  0xe5   :  { %v154_v36 = vpop.f32.mrb[6].mxu0  ;;  %670 = vmatprep.subr.bf16.mxu1 %v669_v32  ;;  %v164_v43 = vmax.f32 %v151_v35, 0.0 }
  0xe6   :  { %v155_v37 = vadd.f32 %v154_v36, %v48_v34  ;;  %v156_v38 = vpop.f32.mrb[7].mxu0  ;;  %672 = vmatpush1.bf16.msra.mxu1 %v671_v31 }
  0xe7   :  { %v157_v39 = vadd.f32 %v156_v38, %v48_v34 }
  0xe8   :  { %v165_v41 = vmax.f32 %v155_v37, 0.0 }
  0xe9   :  { %v166_v44 = vmax.f32 %v157_v39, 0.0 }
  0xea   :  { %v675_v45 = vpack.c.bf16 %v165_v41, %v163_v40 }
  0xeb   :  { %v673_v46 = vpack.c.bf16 %v166_v44, %v164_v43 }
  0xed   :  { %674 = vmatprep.subr.bf16.mxu1 %v673_v46 }
  0xee   :  { %676 = vmatpush1.bf16.msra.mxu1 %v675_v45 }
  0xef   :  { %661 = vmatprep.subr.msk.mxu1 %vm65_vm0, %v360_v47 }
  0xf1   :  { %658 = vmatmul.mubr.msk.f32.vlgmr.msra.gmra.mrb[0].mxu1 %vm181_vm2, %v848_v48 }
  0xf2   :  { %258 = vmatprep.mubr.f32.mxu1 %v750_v2  ;;  %662 = vmatpush1.msk.msra.mxu1 %vm65_vm0, %v660_v42 }
  0xf5   :  { %659 = vmatmul.mubr.msk.f32.gmra.mrb[2].mxu1 %vm181_vm2, %v857_v49 }
  0xf6   :  { %441 = vmatprep.mubr.f32.mxu1 %v750_v2 }
  0xf9   :  { %663 = vmatmul.mubr.msk.f32.vlgmr.msra.gmra.mrb[4].mxu1 %vm52_vm1, %v796_v4 }
  0xfa   :  { %447 = vmatprep.mubr.f32.mxu1 %v750_v2 }
  0xfd   :  { %664 = vmatmul.mubr.msk.f32.gmra.mrb[6].mxu1 %vm52_vm1, %v815_v9 }
  0xfe   :  { %453 = vmatprep.mubr.f32.mxu1 %v750_v2 }
 0x101   :  { %665 = vmatmul.mubr.msk.f32.gmra.mrb[8].mxu1 %vm52_vm1, %v823_v10 }
 0x102   :  { %459 = vmatprep.mubr.f32.mxu1 %v750_v2 }
 0x105   :  { %666 = vmatmul.mubr.msk.f32.gmra.mrb[10].mxu1 %vm52_vm1, %v831_v11 }
 0x1c4   :  { %v254_v55 = vpop.f32.mrb[0].mxu1 }
 0x1c5   :  { %v874_v56 = vadd.f32 %v254_v55, %v174_v54  ;;  %v256_v57 = vpop.f32.mrb[1].mxu1 }
 0x1c6   :  { %v876_v58 = vadd.f32 %v256_v57, %v174_v54 }
 0x1c7   :  { %v269_v59 = vand.u32 2147483647, %v874_v56 }
 0x1c8   :  { %v270_v61 = vand.u32 2147483647, %v876_v58  ;;  %v260_v62 = vpop.f32.mrb[2].mxu1 }
 0x1c9   :  { %v273_v63 = vsub.f32 0.0, %v269_v59  ;;  %v880_v0 = vadd.f32 %v260_v62, %v179_v60  ;;  %v262_v1 = vpop.f32.mrb[3].mxu1  ;;  %v265_v62 = vmax.f32 %v874_v56, 0.0 }
 0x1ca   :  { %v274_v3 = vsub.f32 0.0, %v270_v61  ;;  %v882_v4 = vadd.f32 %v262_v1, %v179_v60 }
 0x1cb   :  { %v277_v5 = vmul.f32 1.442695, %v273_v63  ;;  %v271_v6 = vand.u32 2147483647, %v880_v0 }
 0x1cc   :  { %v279_v7 = vmul.f32 1.442695, %v274_v3  ;;  %v272_v8 = vand.u32 2147483647, %v882_v4  ;;  %v443_v9 = vpop.f32.mrb[4].mxu1 }
 0x1cd   :  { %694 = vpow2.f32 %v277_v5  ;;  %v275_v10 = vsub.f32 0.0, %v271_v6  ;;  %v445_v11 = vpop.f32.mrb[5].mxu1  ;;  %v444_v14 = vadd.f32 %v443_v9, %v342_v50 }
 0x1ce   :  { %696 = vpow2.f32 %v279_v7  ;;  %v276_v12 = vsub.f32 0.0, %v272_v8  ;;  %v446_v16 = vadd.f32 %v445_v11, %v342_v50  ;;  %v266_v11 = vmax.f32 %v876_v58, 0.0 }
 0x1cf   :  { %v281_v13 = vmul.f32 1.442695, %v275_v10  ;;  %v466_v21 = vmax.f32 %v444_v14, 0.0 }
 0x1d0   :  { %v283_v15 = vmul.f32 1.442695, %v276_v12  ;;  %v449_v17 = vpop.f32.mrb[6].mxu1  ;;  %v467_v23 = vmax.f32 %v446_v16, 0.0 }
 0x1d1   :  { %698 = vpow2.f32 %v281_v13  ;;  %v450_v18 = vadd.f32 %v449_v17, %v347_v51  ;;  %v451_v19 = vpop.f32.mrb[7].mxu1 }
 0x1d2   :  { %700 = vpow2.f32 %v283_v15  ;;  %v452_v20 = vadd.f32 %v451_v19, %v347_v51  ;;  %v267_v19 = vmax.f32 %v880_v0, 0.0 }
 0x1d3   :  { %v468_v22 = vmax.f32 %v450_v18, 0.0 }
 0x1d4   :  { %v469_v24 = vmax.f32 %v452_v20, 0.0  ;;  %v455_v25 = vpop.f32.mrb[8].mxu1 }
 0x1d5   :  { %v679_v26 = vpack.c.bf16 %v468_v22, %v466_v21  ;;  %v457_v27 = vpop.f32.mrb[9].mxu1  ;;  %v456_v32 = vadd.f32 %v455_v25, %v352_v52  ;;  %v268_v22 = vmax.f32 %v882_v4, 0.0 }
 0x1d6   :  { %v677_v28 = vpack.c.bf16 %v469_v24, %v467_v23  ;;  %v458_v38 = vadd.f32 %v457_v27, %v352_v52  ;;  %v481_v24 = vpop.permute.xlu0 %480 }
 0x1d7   :  { %v695_v29 = vpop.eup %694  ;;  %v470_v43 = vmax.f32 %v456_v32, 0.0 }
 0x1d8   :  { %v697_v30 = vpop.eup %696  ;;  %v285_v31 = vadd.f32 1.0, %v695_v29  ;;  %v461_v33 = vpop.f32.mrb[10].mxu1  ;;  %678 = vmatprep.subr.bf16.mxu0 %v677_v28  ;;  %v288_v44 = vmul.f32 -0.5, %v695_v29  ;;  %v471_v50 = vmax.f32 %v458_v38, 0.0  ;;  %v291_v55 = vand.u32 2147483647, %v695_v29 }
 0x1d9   :  { %v294_v34 = vadd.f32 1.0, %v697_v30  ;;  %v462_v35 = vadd.f32 %v461_v33, %v357_v53  ;;  %v463_v36 = vpop.f32.mrb[11].mxu1  ;;  %680 = vmatpush1.bf16.msra.mxu0 %v679_v26  ;;  %v297_v46 = vmul.f32 -0.5, %v697_v30  ;;  %v300_v52 = vand.u32 2147483647, %v697_v30 }
 0x1da   :  { %702 = vlog2.f32 %v285_v31  ;;  %v464_v40 = vadd.f32 %v463_v36, %v357_v53  ;;  %v289_v54 = vadd.f32 1.0, %v288_v44  ;;  %vm292_vm3 = vcmp.lt.f32.partialorder %v291_v55, 0.0004427343 }
 0x1db   :  { %v699_v37 = vpop.eup %698  ;;  %704 = vlog2.f32 %v294_v34  ;;  %v472_v39 = vmax.f32 %v462_v35, 0.0  ;;  %v298_v60 = vadd.f32 1.0, %v297_v46  ;;  %vm301_vm4 = vcmp.lt.f32.partialorder %v300_v52, 0.0004427343 }
 0x1dc   :  { %v701_v41 = vpop.eup %700  ;;  %v303_v42 = vadd.f32 1.0, %v699_v37  ;;  %v473_v51 = vmax.f32 %v464_v40, 0.0  ;;  %v306_v57 = vmul.f32 -0.5, %v699_v37  ;;  %v290_v3 = vmul.f32 %v695_v29, %v289_v54  ;;  %v486_v29 = vpop.permute.xlu1 %485 }
 0x1dd   :  { %v312_v45 = vadd.f32 1.0, %v701_v41  ;;  %v683_v47 = vpack.c.bf16 %v472_v39, %v470_v43  ;;  %v315_v61 = vmul.f32 -0.5, %v701_v41  ;;  %v299_v7 = vmul.f32 %v697_v30, %v298_v60 }
 0x1de   :  { %706 = vlog2.f32 %v303_v42  ;;  %v681_v59 = vpack.c.bf16 %v473_v51, %v471_v50  ;;  %v307_v5 = vadd.f32 1.0, %v306_v57  ;;  %v309_v8 = vand.u32 2147483647, %v699_v37 }
 0x1df   :  { %708 = vlog2.f32 %v312_v45  ;;  %v316_v9 = vadd.f32 1.0, %v315_v61  ;;  %v318_v12 = vand.u32 2147483647, %v701_v41 }
 0x1e0   :  { %682 = vmatprep.subr.bf16.mxu0 %v681_v59  ;;  %v308_v18 = vmul.f32 %v699_v37, %v307_v5  ;;  %vm310_vm5 = vcmp.lt.f32.partialorder %v309_v8, 0.0004427343 }
 0x1e1   :  { %684 = vmatpush1.bf16.msra.mxu0 %v683_v47  ;;  %v317_v58 = vmul.f32 %v701_v41, %v316_v9  ;;  %vm319_vm6 = vcmp.lt.f32.partialorder %v318_v12, 0.0004427343 }
 0x1e4   :  { %v703_v53 = vpop.eup %702  ;;  %667 = vmatmul.mubr.msk.f32.vlgmr.msra.gmra.mrb[8].mxu0 %vm181_vm2, %v848_v48 }
 0x1e5   :  { %v705_v63 = vpop.eup %704  ;;  %v287_v1 = vmul.f32 0.6931472, %v703_v53  ;;  %564 = vmatprep.mubr.f32.mxu0 %v750_v2 }
 0x1e6   :  { %v296_v6 = vmul.f32 0.6931472, %v705_v63 }
 0x1e7   :  { %v293_v10 = vsel %vm292_vm3, %v290_v3, %v287_v1 }
 0x1e8   :  { %v707_v13 = vpop.eup %706  ;;  %v321_v56 = vadd.f32 %v293_v10, %v265_v62  ;;  %v302_v14 = vsel %vm301_vm4, %v299_v7, %v296_v6  ;;  %668 = vmatmul.mubr.msk.f32.gmra.mrb[10].mxu0 %vm181_vm2, %v857_v49 }
 0x1e9   :  { %v709_v15 = vpop.eup %708  ;;  %v322_v16 = vadd.f32 %v302_v14, %v266_v11  ;;  %v305_v17 = vmul.f32 0.6931472, %v707_v13 }
 0x1ea   :  { %325 = vst [vmem:[#allocation2] sm:$0xff] %v321_v56  ;;  %v314_v20 = vmul.f32 0.6931472, %v709_v15 }
 0x1eb   :  { %326 = vst [vmem:[#allocation2 + $0x8] sm:$0xff] %v322_v16  ;;  %v311_v21 = vsel %vm310_vm5, %v308_v18, %v305_v17 }
 0x1ec   :  { %v323_v48 = vadd.f32 %v311_v21, %v267_v19  ;;  %v320_v2 = vsel %vm319_vm6, %v317_v58, %v314_v20 }
 0x1ed   :  { %v324_v23 = vadd.f32 %v320_v2, %v268_v22 }
 0x1ee   :  { %327 = vst [vmem:[#allocation2 + $0x10] sm:$0xff] %v323_v48 }
 0x1ef   :  { %328 = vst [vmem:[#allocation2 + $0x18] sm:$0xff] %v324_v23 }
 0x2b7   :  { %v560_v25 = vpop.f32.mrb[8].mxu0 }
 0x2b8   :  { %v561_v26 = vadd.f32 %v560_v25, %v481_v24  ;;  %v562_v0 = vpop.f32.mrb[9].mxu0 }
 0x2b9   :  { %v563_v27 = vadd.f32 %v562_v0, %v481_v24 }
 0x2ba   :  { %v575_v28 = vand.u32 2147483647, %v561_v26  ;;  %v571_v1 = vmax.f32 %v561_v26, 0.0 }
 0x2bb   :  { %v576_v30 = vand.u32 2147483647, %v563_v27  ;;  %v566_v31 = vpop.f32.mrb[10].mxu0  ;;  %v572_v13 = vmax.f32 %v563_v27, 0.0 }
 0x2bc   :  { %v579_v32 = vsub.f32 0.0, %v575_v28  ;;  %v895_v4 = vadd.f32 %v566_v31, %v486_v29  ;;  %v568_v33 = vpop.f32.mrb[11].mxu0 }
 0x2bd   :  { %v580_v34 = vsub.f32 0.0, %v576_v30  ;;  %v897_v49 = vadd.f32 %v568_v33, %v486_v29 }
 0x2be   :  { %v583_v35 = vmul.f32 1.442695, %v579_v32  ;;  %v577_v36 = vand.u32 2147483647, %v895_v4  ;;  %v573_v58 = vmax.f32 %v895_v4, 0.0 }
 0x2bf   :  { %v585_v37 = vmul.f32 1.442695, %v580_v34  ;;  %v578_v38 = vand.u32 2147483647, %v897_v49  ;;  %v574_v2 = vmax.f32 %v897_v49, 0.0 }
 0x2c0   :  { %710 = vpow2.f32 %v583_v35  ;;  %v581_v39 = vsub.f32 0.0, %v577_v36 }
 0x2c1   :  { %712 = vpow2.f32 %v585_v37  ;;  %v582_v40 = vsub.f32 0.0, %v578_v38 }
 0x2c2   :  { %v587_v41 = vmul.f32 1.442695, %v581_v39 }
 0x2c3   :  { %v589_v42 = vmul.f32 1.442695, %v582_v40 }
 0x2c4   :  { %714 = vpow2.f32 %v587_v41 }
 0x2c5   :  { %716 = vpow2.f32 %v589_v42 }
 0x2ca   :  { %v711_v43 = vpop.eup %710 }
 0x2cb   :  { %v713_v44 = vpop.eup %712  ;;  %v591_v45 = vadd.f32 1.0, %v711_v43  ;;  %v594_v54 = vmul.f32 -0.5, %v711_v43  ;;  %v597_v60 = vand.u32 2147483647, %v711_v43 }
 0x2cc   :  { %v600_v46 = vadd.f32 1.0, %v713_v44  ;;  %v603_v57 = vmul.f32 -0.5, %v713_v44  ;;  %v606_v62 = vand.u32 2147483647, %v713_v44 }
 0x2cd   :  { %718 = vlog2.f32 %v591_v45  ;;  %v595_v59 = vadd.f32 1.0, %v594_v54  ;;  %vm598_vm7 = vcmp.lt.f32.partialorder %v597_v60, 0.0004427343 }
 0x2ce   :  { %v715_v47 = vpop.eup %714  ;;  %720 = vlog2.f32 %v600_v46  ;;  %v604_v52 = vadd.f32 1.0, %v603_v57  ;;  %vm607_vm8 = vcmp.lt.f32.partialorder %v606_v62, 0.0004427343 }
 0x2cf   :  { %v717_v50 = vpop.eup %716  ;;  %v609_v51 = vadd.f32 1.0, %v715_v47  ;;  %v612_v61 = vmul.f32 -0.5, %v715_v47  ;;  %v596_v6 = vmul.f32 %v711_v43, %v595_v59  ;;  %v615_v10 = vand.u32 2147483647, %v715_v47 }
 0x2d0   :  { %v618_v55 = vadd.f32 1.0, %v717_v50  ;;  %v621_v53 = vmul.f32 -0.5, %v717_v50  ;;  %v605_v9 = vmul.f32 %v713_v44, %v604_v52  ;;  %v624_v56 = vand.u32 2147483647, %v717_v50 }
 0x2d1   :  { %722 = vlog2.f32 %v609_v51  ;;  %v613_v7 = vadd.f32 1.0, %v612_v61  ;;  %vm616_vm9 = vcmp.lt.f32.partialorder %v615_v10, 0.0004427343 }
 0x2d2   :  { %724 = vlog2.f32 %v618_v55  ;;  %v622_v11 = vadd.f32 1.0, %v621_v53  ;;  %vm625_vm10 = vcmp.lt.f32.partialorder %v624_v56, 0.0004427343 }
 0x2d3   :  { %v614_v20 = vmul.f32 %v715_v47, %v613_v7 }
 0x2d4   :  { %v623_v22 = vmul.f32 %v717_v50, %v622_v11 }
 0x2d7   :  { %v719_v63 = vpop.eup %718 }
 0x2d8   :  { %v721_v3 = vpop.eup %720  ;;  %v593_v5 = vmul.f32 0.6931472, %v719_v63 }
 0x2d9   :  { %v602_v8 = vmul.f32 0.6931472, %v721_v3 }
 0x2da   :  { %v599_v12 = vsel %vm598_vm7, %v596_v6, %v593_v5 }
 0x2db   :  { %v723_v14 = vpop.eup %722  ;;  %v627_v15 = vadd.f32 %v599_v12, %v571_v1  ;;  %v608_v16 = vsel %vm607_vm8, %v605_v9, %v602_v8 }
 0x2dc   :  { %v725_v17 = vpop.eup %724  ;;  %v628_v18 = vadd.f32 %v608_v16, %v572_v13  ;;  %v611_v19 = vmul.f32 0.6931472, %v723_v14 }
 0x2dd   :  { %632 = vst [vmem:[#allocation2 + $0x20] sm:$0xff] %v627_v15  ;;  %v620_v21 = vmul.f32 0.6931472, %v725_v17 }
 0x2de   :  { %633 = vst [vmem:[#allocation2 + $0x28] sm:$0xff] %v628_v18  ;;  %v617_v48 = vsel %vm616_vm9, %v614_v20, %v611_v19 }
 0x2df   :  { %v629_v23 = vadd.f32 %v617_v48, %v573_v58  ;;  %v626_v24 = vsel %vm625_vm10, %v623_v22, %v620_v21 }
 0x2e0   :  { %v630_v25 = vadd.f32 %v626_v24, %v574_v2 }
 0x2e1   :  { %634 = vst [vmem:[#allocation2 + $0x30] sm:$0xff] %v629_v23 }
 0x2e2   :  { %635 = vst [vmem:[#allocation2 + $0x38] sm:$0xff] %v630_v25 }
 0x2e3   :  { %737 = shalt.err (!%p734_p4)
}
 0x2e4   :  { %s738_s21 = scalar_lea.hbm %s920_s5, 1024 }
 0x2e5   :  { %p739_p5 = scmp.ne.s32.totalorder %s920_s5, %s738_s21  ;;  %p742_p6 = scmp.lt.u32.totalorder %s738_s21, %s920_s5 }
 0x2e7   :  { %p744_p7 = pnand %p742_p6, %p739_p5 }
 0x2e9   :  { %747 = shalt.err (!%p744_p7)
}
 0x2ea   :  { %s753_s26 = smov 256   ;;  %s754_s27 = smov 16  }
 0x2eb   :  { %647 = dma.vmem_to_hbm [thread:$0]  %s642_s17, 1024, %s920_s5, [#allocation3], %s753_s26, %s753_s26, %s754_s27  }
 0x2ec   :  { %748 = dma.done.wait [#allocation3], 1024  }
 0x2ed   :  { %749 = vsyncadd [#allocation3], 4294966272 }
 0x2ee   :  { %651 = vsyncpa [#allocation3], 1 }

</bundles_post_ra>
